<compile_context>
chip_gen: v6e
topology: v6e:2x2x1
jax: 0.10.0
libtpu: 0.0.40
codegen_flags: <defaults>
</compile_context>

<pallas_src>
import jax
import jax.numpy as jnp
from jax.experimental import pallas as pl
from jax.experimental.pallas import tpu as pltpu

LANE = 128      # vreg lane width
SUBLANE = 8     # f32 sublane multiple


def _round_up(x, m):
    return (x + m - 1) // m * m


# ----------------------------------------------------------------------------
# Kernel
# ----------------------------------------------------------------------------
def actor_mlp_kernel(x_ref, w1_ref, b1_ref, w2_ref, b2_ref, w3_ref, b3_ref,
                     o_ref):
    """Fused 3-layer MLP + ReLU for one batch tile.

    MXU operands use the weights' dtype (f32 or bf16); accumulation, bias add
    and ReLU are always f32.  The state cast happens HERE (not in the wrapper)
    so the HBM-resident state is read exactly once.
    """
    dot_dtype = w1_ref.dtype
    x = x_ref[...].astype(dot_dtype)

    # Layer 1: Linear(state_dim -> hidden_pad) + ReLU
    h = jnp.dot(x, w1_ref[...], preferred_element_type=jnp.float32) + b1_ref[...]
    h = jnp.maximum(h, 0.0)

    # Layer 2: Linear(hidden_pad -> hidden_pad) + ReLU
    h = jnp.dot(h.astype(dot_dtype), w2_ref[...],
                preferred_element_type=jnp.float32) + b2_ref[...]
    h = jnp.maximum(h, 0.0)

    # Layer 3: Linear(hidden_pad -> action_out) + ReLU
    # (Final ReLU matches the PyTorch Actor spec exactly.)
    h = jnp.dot(h.astype(dot_dtype), w3_ref[...],
                preferred_element_type=jnp.float32) + b3_ref[...]
    o_ref[...] = jnp.maximum(h, 0.0).astype(o_ref.dtype)


# ----------------------------------------------------------------------------
# Wrapper
# ----------------------------------------------------------------------------
def actor_forward(state, prepared_params, action_dim, *, tile_b=8192):
    """Run the Actor forward pass via pallas_call.

    state:            (B, state_dim) float32 (NOT pre-cast / pre-padded)
    prepared_params:  output of prepare_actor_params
    action_dim:       true (unpadded) number of actions
    tile_b:           requested batch tile (rounded to a sublane multiple)
    """
    # TODO(synk): optional tiny-batch XLA bypass (B < ~1k) would skip pallas
    # fixed cost for inference-style calls; kept on the kernel path here.
    p = prepared_params
    B, S = state.shape
    H_pad = p["w1"].shape[1]
    A_out = p["w3"].shape[1]          # narrow output: round_up(action_dim, 8)

    # Batch tile: sublane multiple, capped at ceil(B/2) so the grid has >= 2
    # steps whenever possible (lets "parallel" shard across v7x's 2 TCs).
    tile = _round_up(min(tile_b, max(B, SUBLANE)), SUBLANE)
    half = _round_up(pl.cdiv(B, 2), SUBLANE)
    tile = max(SUBLANE, min(tile, half))
    grid = (pl.cdiv(B, tile),)        # ragged tail handled by Pallas edge blocks

    in_specs = [
        pl.BlockSpec((tile, S), lambda i: (i, 0)),         # state tile (pipelined)
        pl.BlockSpec((S, H_pad), lambda i: (0, 0)),        # w1 (VMEM-resident)
        pl.BlockSpec((1, H_pad), lambda i: (0, 0)),        # b1
        pl.BlockSpec((H_pad, H_pad), lambda i: (0, 0)),    # w2
        pl.BlockSpec((1, H_pad), lambda i: (0, 0)),        # b2
        pl.BlockSpec((H_pad, A_out), lambda i: (0, 0)),    # w3 (narrow)
        pl.BlockSpec((1, A_out), lambda i: (0, 0)),        # b3
    ]
    out_specs = pl.BlockSpec((tile, A_out), lambda i: (i, 0))  # narrow store

    # Advisory cost for XLA's scheduler.
    flops = 2 * B * (S * H_pad + H_pad * H_pad + H_pad * A_out)
    weight_bytes = sum(int(v.size) * int(v.dtype.itemsize) for v in p.values())
    bytes_accessed = int(B * S * state.dtype.itemsize + B * A_out * 4
                         + weight_bytes)
    cost = pl.CostEstimate(flops=flops, transcendentals=0,
                           bytes_accessed=bytes_accessed)

    out = pl.pallas_call(
        actor_mlp_kernel,
        out_shape=jax.ShapeDtypeStruct((B, A_out), jnp.float32),
        grid=grid,
        in_specs=in_specs,
        out_specs=out_specs,
        compiler_params=pltpu.CompilerParams(
            dimension_semantics=("parallel",),   # shard batch over v7x's 2 TCs
        ),
        cost_estimate=cost,
    )(state, p["w1"], p["b1"], p["w2"], p["b2"], p["w3"], p["b3"])

    return out if A_out == action_dim else out[:, :action_dim]


# ----------------------------------------------------------------------------
# Params
# ----------------------------------------------------------------------------
def init_actor_params(key, state_dim, action_dim, hidden_size=48):
    """Deterministic init matching the nn.Linear shapes of the PyTorch Actor
    (weights stored transposed: (in_features, out_features))."""
    ks = jax.random.split(key, 6)

    def linear(kw, kb, fan_in, fan_out):
        bound = 1.0 / jnp.sqrt(jnp.float32(fan_in))  # PyTorch default init
        w = jax.random.uniform(kw, (fan_in, fan_out), jnp.float32, -bound, bound)
        b = jax.random.uniform(kb, (1, fan_out), jnp.float32, -bound, bound)
        return w, b

    w1, b1 = linear(ks[0], ks[1], state_dim, hidden_size)
    w2, b2 = linear(ks[2], ks[3], hidden_size, hidden_size)
    w3, b3 = linear(ks[4], ks[5], hidden_size, action_dim)
    return {"w1": w1, "b1": b1, "w2": w2, "b2": b2, "w3": w3, "b3": b3}


def prepare_actor_params(params, compute_dtype=jnp.float32):
    """One-time padding of the weights:
       * hidden axis -> 128 lanes (exact for Linear+ReLU, lane-dense MXU tiles)
       * action axis -> round_up(action_dim, 8) only (narrow, write-light output)
    Biases stay f32 (bias-add / ReLU always run in f32)."""
    S, H = params["w1"].shape
    A = params["w3"].shape[1]
    H_pad = _round_up(H, LANE)
    A_out = _round_up(A, SUBLANE)

    def pad2(x, rows, cols):
        return jnp.pad(x, ((0, rows - x.shape[0]), (0, cols - x.shape[1])))

    prepared = {
        "w1": pad2(params["w1"], S, H_pad).astype(compute_dtype),
        "b1": pad2(params["b1"], 1, H_pad).astype(jnp.float32),
        "w2": pad2(params["w2"], H_pad, H_pad).astype(compute_dtype),
        "b2": pad2(params["b2"], 1, H_pad).astype(jnp.float32),
        "w3": pad2(params["w3"], H_pad, A_out).astype(compute_dtype),
        "b3": pad2(params["b3"], 1, A_out).astype(jnp.float32),
    }
    return prepared, A


# ----------------------------------------------------------------------------
# Plain-JAX reference
# ----------------------------------------------------------------------------
def actor_forward_ref(state, params, compute_dtype=jnp.float32):
    cd = compute_dtype
    x = state.astype(cd)
    h = jnp.maximum(jnp.dot(x, params["w1"].astype(cd),
                            preferred_element_type=jnp.float32) + params["b1"], 0.0)
    h = jnp.maximum(jnp.dot(h.astype(cd), params["w2"].astype(cd),
                            preferred_element_type=jnp.float32) + params["b2"], 0.0)
    h = jnp.maximum(jnp.dot(h.astype(cd), params["w3"].astype(cd),
                            preferred_element_type=jnp.float32) + params["b3"], 0.0)
    return h


if __name__ == "__main__":
    key = jax.random.PRNGKey(0)
    k_state, k_params, k_mid, k_big = jax.random.split(key, 4)

    batch, state_dim, action_dim, hidden = 2, 16, 4, 48
    state = jax.random.normal(k_state, (batch, state_dim), dtype=jnp.float32)
    params = init_actor_params(k_params, state_dim, action_dim, hidden)

    # --- f32 path, tiny batch (single partial grid step) ---
    prepared_f32, adim = prepare_actor_params(params, jnp.float32)
    out = jax.block_until_ready(actor_forward(state, prepared_f32, adim))
    ref = actor_forward_ref(state, params)
    assert out.shape == (batch, action_dim), out.shape
    assert jnp.allclose(out, ref, atol=1e-5, rtol=1e-5), "f32 mismatch vs reference"

    # --- f32 path, multi-step grid with ragged tail (B=200, tile_b=64) ---
    state200 = jax.random.normal(k_mid, (200, state_dim), dtype=jnp.float32)
    out200 = jax.block_until_ready(
        actor_forward(state200, prepared_f32, adim, tile_b=64))
    ref200 = actor_forward_ref(state200, params)
    assert out200.shape == (200, action_dim), out200.shape
    assert jnp.allclose(out200, ref200, atol=1e-4, rtol=1e-4), "ragged-tile mismatch"

    # --- f32 path, default tile with the v7x 2-step cap (B=1000 -> grid=2) ---
    state1k = jax.random.normal(k_big, (1000, state_dim), dtype=jnp.float32)
    out1k = jax.block_until_ready(actor_forward(state1k, prepared_f32, adim))
    ref1k = actor_forward_ref(state1k, params)
    assert out1k.shape == (1000, action_dim), out1k.shape
    assert jnp.allclose(out1k, ref1k, atol=1e-4, rtol=1e-4), "large-tile mismatch"

    # --- bf16 MXU operands, f32 accumulation; state stays f32, cast in-kernel ---
    prepared_bf16, _ = prepare_actor_params(params, jnp.bfloat16)
    out_bf16 = jax.block_until_ready(actor_forward(state, prepared_bf16, adim))
    ref_bf16 = actor_forward_ref(state, params, compute_dtype=jnp.bfloat16)
    assert jnp.allclose(out_bf16, ref_bf16, atol=1e-2, rtol=1e-2), "bf16 mismatch"

    print("KERNEL_OK")
</pallas_src>

<mosaic_0001>
module attributes {stable_mosaic.version = 11 : i64} {
  func.func @actor_mlp_kernel(%arg0: i32, %arg1: memref<8x16xf32, #tpu.memory_space<vmem>>, %arg2: memref<16x128xf32, #tpu.memory_space<vmem>>, %arg3: memref<1x128xf32, #tpu.memory_space<vmem>>, %arg4: memref<128x128xf32, #tpu.memory_space<vmem>>, %arg5: memref<1x128xf32, #tpu.memory_space<vmem>>, %arg6: memref<128x8xf32, #tpu.memory_space<vmem>>, %arg7: memref<1x8xf32, #tpu.memory_space<vmem>>, %arg8: memref<8x8xf32, #tpu.memory_space<vmem>>) attributes {dimension_semantics = [#tpu.dimension_semantics<parallel>], iteration_bounds = array<i64: 1>, scalar_prefetch = 0 : i64, scratch_operands = 0 : i64, tpu.core_type = #tpu.core_type<tc>, window_params = [{transform_indices = @transform_0, window_bounds = array<i64: 8, 16>}, {pipeline_mode = #tpu.pipeline_mode<synchronous>, transform_indices = @transform_1, window_bounds = array<i64: 16, 128>}, {pipeline_mode = #tpu.pipeline_mode<synchronous>, transform_indices = @transform_2, window_bounds = array<i64: 1, 128>}, {pipeline_mode = #tpu.pipeline_mode<synchronous>, transform_indices = @transform_3, window_bounds = array<i64: 128, 128>}, {pipeline_mode = #tpu.pipeline_mode<synchronous>, transform_indices = @transform_4, window_bounds = array<i64: 1, 128>}, {pipeline_mode = #tpu.pipeline_mode<synchronous>, transform_indices = @transform_5, window_bounds = array<i64: 128, 8>}, {pipeline_mode = #tpu.pipeline_mode<synchronous>, transform_indices = @transform_6, window_bounds = array<i64: 1, 8>}, {transform_indices = @transform_7, window_bounds = array<i64: 8, 8>}]} {
    %c0 = arith.constant 0 : index
    %c0_0 = arith.constant 0 : index
    %0 = vector.load %arg1[%c0, %c0_0] : memref<8x16xf32, #tpu.memory_space<vmem>>, vector<8x16xf32>
    %c0_1 = arith.constant 0 : index
    %c0_2 = arith.constant 0 : index
    %1 = vector.load %arg2[%c0_1, %c0_2] : memref<16x128xf32, #tpu.memory_space<vmem>>, vector<16x128xf32>
    %cst = arith.constant dense<0.000000e+00> : vector<8x128xf32>
    %2 = tpu.matmul %0, %1, %cst {dimension_numbers = #tpu.dot_dimension_numbers<[1], [0], [0], [1], [0, 0, 1, 1], [], []>} : vector<8x16xf32>, vector<16x128xf32>, vector<8x128xf32> -> vector<8x128xf32>
    %c0_3 = arith.constant 0 : index
    %c0_4 = arith.constant 0 : index
    %3 = vector.load %arg3[%c0_3, %c0_4] : memref<1x128xf32, #tpu.memory_space<vmem>>, vector<1x128xf32>
    %4 = vector.broadcast %3 : vector<1x128xf32> to vector<8x128xf32>
    %5 = arith.addf %2, %4 : vector<8x128xf32>
    %cst_5 = arith.constant 0.000000e+00 : f32
    %6 = vector.broadcast %cst_5 : f32 to vector<8x128xf32>
    %7 = arith.maximumf %5, %6 : vector<8x128xf32>
    %c0_6 = arith.constant 0 : index
    %c0_7 = arith.constant 0 : index
    %8 = vector.load %arg4[%c0_6, %c0_7] : memref<128x128xf32, #tpu.memory_space<vmem>>, vector<128x128xf32>
    %cst_8 = arith.constant dense<0.000000e+00> : vector<8x128xf32>
    %9 = tpu.matmul %7, %8, %cst_8 {dimension_numbers = #tpu.dot_dimension_numbers<[1], [0], [0], [1], [0, 0, 1, 1], [], []>} : vector<8x128xf32>, vector<128x128xf32>, vector<8x128xf32> -> vector<8x128xf32>
    %c0_9 = arith.constant 0 : index
    %c0_10 = arith.constant 0 : index
    %10 = vector.load %arg5[%c0_9, %c0_10] : memref<1x128xf32, #tpu.memory_space<vmem>>, vector<1x128xf32>
    %11 = vector.broadcast %10 : vector<1x128xf32> to vector<8x128xf32>
    %12 = arith.addf %9, %11 : vector<8x128xf32>
    %cst_11 = arith.constant 0.000000e+00 : f32
    %13 = vector.broadcast %cst_11 : f32 to vector<8x128xf32>
    %14 = arith.maximumf %12, %13 : vector<8x128xf32>
    %c0_12 = arith.constant 0 : index
    %c0_13 = arith.constant 0 : index
    %15 = vector.load %arg6[%c0_12, %c0_13] : memref<128x8xf32, #tpu.memory_space<vmem>>, vector<128x8xf32>
    %cst_14 = arith.constant dense<0.000000e+00> : vector<8x8xf32>
    %16 = tpu.matmul %14, %15, %cst_14 {dimension_numbers = #tpu.dot_dimension_numbers<[1], [0], [0], [1], [0, 0, 1, 1], [], []>} : vector<8x128xf32>, vector<128x8xf32>, vector<8x8xf32> -> vector<8x8xf32>
    %c0_15 = arith.constant 0 : index
    %c0_16 = arith.constant 0 : index
    %17 = vector.load %arg7[%c0_15, %c0_16] : memref<1x8xf32, #tpu.memory_space<vmem>>, vector<1x8xf32>
    %18 = vector.broadcast %17 : vector<1x8xf32> to vector<8x8xf32>
    %19 = arith.addf %16, %18 : vector<8x8xf32>
    %cst_17 = arith.constant 0.000000e+00 : f32
    %20 = vector.broadcast %cst_17 : f32 to vector<8x8xf32>
    %21 = arith.maximumf %19, %20 : vector<8x8xf32>
    %c0_18 = arith.constant 0 : index
    %c0_19 = arith.constant 0 : index
    %22 = vector.load %arg8[%c0_18, %c0_19] : memref<8x8xf32, #tpu.memory_space<vmem>>, vector<8x8xf32>
    tpu.vector_store %arg8[%c0_18, %c0_19], %21 {strides = array<i32>} : memref<8x8xf32, #tpu.memory_space<vmem>>, vector<8x8xf32>,
    return
  }
  func.func @transform_0(%arg0: i32) -> (i32, i32) {
    %c0_i32 = arith.constant 0 : i32
    %c0_i32_0 = arith.constant 0 : i32
    return %arg0, %c0_i32 : i32, i32
  }
  func.func @transform_1(%arg0: i32) -> (i32, i32) {
    %c0_i32 = arith.constant 0 : i32
    %c0_i32_0 = arith.constant 0 : i32
    %c0_i32_1 = arith.constant 0 : i32
    return %c0_i32, %c0_i32_0 : i32, i32
  }
  func.func @transform_2(%arg0: i32) -> (i32, i32) {
    %c0_i32 = arith.constant 0 : i32
    %c0_i32_0 = arith.constant 0 : i32
    %c0_i32_1 = arith.constant 0 : i32
    return %c0_i32, %c0_i32_0 : i32, i32
  }
  func.func @transform_3(%arg0: i32) -> (i32, i32) {
    %c0_i32 = arith.constant 0 : i32
    %c0_i32_0 = arith.constant 0 : i32
    %c0_i32_1 = arith.constant 0 : i32
    return %c0_i32, %c0_i32_0 : i32, i32
  }
  func.func @transform_4(%arg0: i32) -> (i32, i32) {
    %c0_i32 = arith.constant 0 : i32
    %c0_i32_0 = arith.constant 0 : i32
    %c0_i32_1 = arith.constant 0 : i32
    return %c0_i32, %c0_i32_0 : i32, i32
  }
  func.func @transform_5(%arg0: i32) -> (i32, i32) {
    %c0_i32 = arith.constant 0 : i32
    %c0_i32_0 = arith.constant 0 : i32
    %c0_i32_1 = arith.constant 0 : i32
    return %c0_i32, %c0_i32_0 : i32, i32
  }
  func.func @transform_6(%arg0: i32) -> (i32, i32) {
    %c0_i32 = arith.constant 0 : i32
    %c0_i32_0 = arith.constant 0 : i32
    %c0_i32_1 = arith.constant 0 : i32
    return %c0_i32, %c0_i32_0 : i32, i32
  }
  func.func @transform_7(%arg0: i32) -> (i32, i32) {
    %c0_i32 = arith.constant 0 : i32
    %c0_i32_0 = arith.constant 0 : i32
    return %arg0, %c0_i32 : i32, i32
  }
}

</mosaic_0001>

<bundles_post_ra>
// kernel: tpu_custom_call.1
= control target key start
LH: loop header
LB: loop body
LE: loop exit
PB: predicated region body
PF: predicated region fallthrough
CT: control target
= control target key end

     0   :  { %12 = vsyncpa [#allocation3], 0  ;;  %s705_s0 = inlined_call_operand.vmem [shape: f32[2,16], index: 0, kind: input, shape index: {}]   ;;  %s706_s1 = inlined_call_operand.hbm [shape: f32[16,128], index: 1, kind: input, shape index: {}]   ;;  %s707_s2 = inlined_call_operand.vmem [shape: f32[1,128], index: 2, kind: input, shape index: {}]   ;;  %s708_s3 = inlined_call_operand.vmem [shape: f32[128,128], index: 3, kind: input, shape index: {}]   ;;  %s709_s4 = inlined_call_operand.vmem [shape: f32[1,128], index: 4, kind: input, shape index: {}]   ;;  %s710_s5 = inlined_call_operand.vmem [shape: f32[128,8], index: 5, kind: input, shape index: {}]   ;;  %s711_s6 = inlined_call_operand.vmem [shape: f32[1,8], index: 6, kind: input, shape index: {}]   ;;  %s712_s7 = inlined_call_operand.hbm [shape: f32[2,8], index: 7, kind: output, shape index: {}]  }
   0x1   :  { %13 = vsyncpa [#allocation4], 0  ;;  %s503_s24 = smov [#allocation2]  }
   0x2   :  { %s21_s25 = sshll.u32 %s503_s24, 4  ;;  %s22_s25 = int_to_ptr.vmem [resolvable:$true] %s21_s25 }
   0x3   :  { %s467_s26 = scalar_lea.vmem %s22_s25, 256  ;;  %p472_p1 = scmp.lt.s32.totalorder %s22_s25, %s22_s25 }
   0x4   :  { %p468_p0 = scmp.ne.s32.totalorder %s22_s25, %s467_s26  ;;  %p473_p2 = scmp.lt.s32.totalorder %s467_s26, %s467_s26 }
   0x6   :  { %p474_p3 = por %p473_p2, %p472_p1 }
   0x8   :  { %p475_p4 = pnand %p474_p3, %p468_p0 }
   0xa   :  { %478 = shalt.err (!%p475_p4)
}
   0xb   :  { %s504_s27 = smov 128   ;;  %s505_s28 = smov 8  }
   0xc   :  { %27 = dma.hbm_to_vmem [thread:$0]  %s706_s1, 256, %s22_s25, [#allocation3], %s504_s27, %s504_s27, %s505_s28  }
   0xd   :  { %499 = dma.done.wait [#allocation3], 256  }
   0xe   :  { %500 = vsyncadd [#allocation3], 4294967040  ;;  %v506_v0 = vmov 0.0   ;;  %vm507_vm0 = vmmov 0   ;;  %v43_v1 = vld [vmem:[#allocation2 + $0x8] sm:$0xff]  ;;  %v42_v2 = vld [vmem:[#allocation2] sm:$0xff] }
   0xf   :  { %374 = vmatprep.subr.mxu0 %v506_v0  ;;  %378 = vmatprep.mubr.msk.f32.mxu0 %vm507_vm0, %v506_v0  ;;  %v41_v3 = vld [vmem:[%s705_s0] sm:$0xff]  ;;  %vm51_vm1 = vcmask 130048   ;;  %v141_v4 = vld [vmem:[%s708_s3 + $0x78] sm:$0xff]  ;;  %v140_v5 = vld [vmem:[%s708_s3 + $0x70] sm:$0xff]  ;;  %vm314_vm2 = vcmask 64512  }
  0x10   :  { %381 = vmatprep.subr.mxu1 %v506_v0  ;;  %413 = vmatprep.mubr.msk.f32.mxu1 %vm507_vm0, %v506_v0  ;;  %v139_v6 = vld [vmem:[%s708_s3 + $0x68] sm:$0xff]  ;;  %v138_v7 = vld [vmem:[%s708_s3 + $0x60] sm:$0xff]  ;;  %v137_v8 = vld [vmem:[%s708_s3 + $0x58] sm:$0xff] }
  0x11   :  { %375 = vmatpush3.msra.mxu0 %v43_v1  ;;  %382 = vmatpush3.msra.mxu1 %v141_v4  ;;  %v136_v9 = vld [vmem:[%s708_s3 + $0x50] sm:$0xff]  ;;  %v135_v10 = vld [vmem:[%s708_s3 + $0x48] sm:$0xff]  ;;  %v134_v11 = vld [vmem:[%s708_s3 + $0x40] sm:$0xff] }
  0x12   :  { %376 = vmatprep.subr.mxu0 %v506_v0  ;;  %383 = vmatprep.subr.mxu1 %v506_v0  ;;  %v133_v12 = vld [vmem:[%s708_s3 + $0x38] sm:$0xff]  ;;  %v132_v13 = vld [vmem:[%s708_s3 + $0x30] sm:$0xff]  ;;  %v131_v14 = vld [vmem:[%s708_s3 + $0x28] sm:$0xff] }
  0x13   :  { %377 = vmatpush3.msra.mxu0 %v42_v2  ;;  %384 = vmatpush3.msra.mxu1 %v140_v5  ;;  %v130_v15 = vld [vmem:[%s708_s3 + $0x20] sm:$0xff]  ;;  %v129_v16 = vld [vmem:[%s708_s3 + $0x18] sm:$0xff]  ;;  %v128_v17 = vld [vmem:[%s708_s3 + $0x10] sm:$0xff] }
  0x14   :  { %379 = vmatmul.mubr.msk.f32.vlgmr.msra.gmra.mxu0 %vm51_vm1, %v41_v3  ;;  %385 = vmatprep.subr.mxu1 %v506_v0  ;;  %v127_v18 = vld [vmem:[%s708_s3 + $0x8] sm:$0xff]  ;;  %v126_v19 = vld [vmem:[%s708_s3] sm:$0xff]  ;;  %v235_v20 = vld [vmem:[%s710_s5 + $0x78] sm:$0xff] }
  0x15   :  { %416 = vmatprep.subr.mxu0 %v506_v0  ;;  %386 = vmatpush3.msra.mxu1 %v139_v6  ;;  %v234_v21 = vld [vmem:[%s710_s5 + $0x70] sm:$0xff]  ;;  %v233_v22 = vld [vmem:[%s710_s5 + $0x68] sm:$0xff]  ;;  %v232_v23 = vld [vmem:[%s710_s5 + $0x60] sm:$0xff] }
  0x16   :  { %448 = vmatprep.mubr.msk.f32.mxu0 %vm507_vm0, %v506_v0  ;;  %387 = vmatprep.subr.mxu1 %v506_v0  ;;  %v231_v24 = vld [vmem:[%s710_s5 + $0x58] sm:$0xff]  ;;  %v230_v25 = vld [vmem:[%s710_s5 + $0x50] sm:$0xff]  ;;  %v229_v26 = vld [vmem:[%s710_s5 + $0x48] sm:$0xff] }
  0x17   :  { %388 = vmatpush3.msra.mxu1 %v138_v7  ;;  %417 = vmatpush3.msra.mxu0 %v235_v20  ;;  %v228_v27 = vld [vmem:[%s710_s5 + $0x40] sm:$0xff]  ;;  %v227_v28 = vld [vmem:[%s710_s5 + $0x38] sm:$0xff]  ;;  %v226_v29 = vld [vmem:[%s710_s5 + $0x30] sm:$0xff] }
  0x18   :  { %389 = vmatprep.subr.mxu1 %v506_v0  ;;  %418 = vmatprep.subr.mxu0 %v506_v0  ;;  %v225_v30 = vld [vmem:[%s710_s5 + $0x28] sm:$0xff]  ;;  %v224_v31 = vld [vmem:[%s710_s5 + $0x20] sm:$0xff]  ;;  %v223_v32 = vld [vmem:[%s710_s5 + $0x18] sm:$0xff] }
  0x19   :  { %390 = vmatpush3.msra.mxu1 %v137_v8  ;;  %419 = vmatpush3.msra.mxu0 %v234_v21  ;;  %v333_v33 = vld [vmem:[%s707_s2] ss:$0 sm:$0xff]  ;;  %v222_v38 = vld [vmem:[%s710_s5 + $0x10] sm:$0xff]  ;;  %v221_v39 = vld [vmem:[%s710_s5 + $0x8] sm:$0xff] }
  0x1a   :  { %391 = vmatprep.subr.mxu1 %v506_v0  ;;  %420 = vmatprep.subr.mxu0 %v506_v0  ;;  %v220_v40 = vld [vmem:[%s710_s5] sm:$0xff] }
  0x1b   :  { %392 = vmatpush3.msra.mxu1 %v136_v9  ;;  %421 = vmatpush3.msra.mxu0 %v233_v22  ;;  %v335_v41 = vld [vmem:[%s709_s4] ss:$0 sm:$0xff] }
  0x1c   :  { %393 = vmatprep.subr.mxu1 %v506_v0  ;;  %422 = vmatprep.subr.mxu0 %v506_v0  ;;  %v336_v46 = vld [vmem:[%s711_s6] ss:$0 sm:$0xff] }
  0x1d   :  { %394 = vmatpush3.msra.mxu1 %v135_v10  ;;  %423 = vmatpush3.msra.mxu0 %v232_v23 }
  0x1e   :  { %395 = vmatprep.subr.mxu1 %v506_v0  ;;  %424 = vmatprep.subr.mxu0 %v506_v0 }
  0x1f   :  { %396 = vmatpush3.msra.mxu1 %v134_v11  ;;  %425 = vmatpush3.msra.mxu0 %v231_v24 }
  0x20   :  { %397 = vmatprep.subr.mxu1 %v506_v0  ;;  %426 = vmatprep.subr.mxu0 %v506_v0 }
  0x21   :  { %398 = vmatpush3.msra.mxu1 %v133_v12  ;;  %427 = vmatpush3.msra.mxu0 %v230_v25 }
  0x22   :  { %399 = vmatprep.subr.mxu1 %v506_v0  ;;  %428 = vmatprep.subr.mxu0 %v506_v0 }
  0x23   :  { %400 = vmatpush3.msra.mxu1 %v132_v13  ;;  %429 = vmatpush3.msra.mxu0 %v229_v26 }
  0x24   :  { %401 = vmatprep.subr.mxu1 %v506_v0  ;;  %430 = vmatprep.subr.mxu0 %v506_v0 }
  0x25   :  { %402 = vmatpush3.msra.mxu1 %v131_v14  ;;  %431 = vmatpush3.msra.mxu0 %v228_v27 }
  0x26   :  { %403 = vmatprep.subr.mxu1 %v506_v0  ;;  %432 = vmatprep.subr.mxu0 %v506_v0 }
  0x27   :  { %404 = vmatpush3.msra.mxu1 %v130_v15  ;;  %433 = vmatpush3.msra.mxu0 %v227_v28 }
  0x28   :  { %405 = vmatprep.subr.mxu1 %v506_v0  ;;  %434 = vmatprep.subr.mxu0 %v506_v0 }
  0x29   :  { %406 = vmatpush3.msra.mxu1 %v129_v16  ;;  %435 = vmatpush3.msra.mxu0 %v226_v29 }
  0x2a   :  { %407 = vmatprep.subr.mxu1 %v506_v0  ;;  %436 = vmatprep.subr.mxu0 %v506_v0 }
  0x2b   :  { %408 = vmatpush3.msra.mxu1 %v128_v17  ;;  %437 = vmatpush3.msra.mxu0 %v225_v30 }
  0x2c   :  { %409 = vmatprep.subr.mxu1 %v506_v0  ;;  %438 = vmatprep.subr.mxu0 %v506_v0 }
  0x2d   :  { %410 = vmatpush3.msra.mxu1 %v127_v18  ;;  %439 = vmatpush3.msra.mxu0 %v224_v31 }
  0x2e   :  { %411 = vmatprep.subr.mxu1 %v506_v0  ;;  %440 = vmatprep.subr.mxu0 %v506_v0 }
  0x2f   :  { %412 = vmatpush3.msra.mxu1 %v126_v19  ;;  %441 = vmatpush3.msra.mxu0 %v223_v32 }
  0x30   :  { %442 = vmatprep.subr.mxu0 %v506_v0 }
  0x31   :  { %443 = vmatpush3.msra.mxu0 %v222_v38 }
  0x32   :  { %444 = vmatprep.subr.mxu0 %v506_v0 }
  0x33   :  { %445 = vmatpush3.msra.mxu0 %v221_v39 }
  0x34   :  { %446 = vmatprep.subr.mxu0 %v506_v0 }
  0x35   :  { %447 = vmatpush3.msra.mxu0 %v220_v40 }
  0xd4   :  { %v121_v34 = vpop.f32.mrf.mxu0 }
  0xd5   :  { %v122_v35 = vadd.f32 %v333_v33, %v121_v34 }
  0xd6   :  { %v380_v36 = vpop.f32.mrf.mxu0 }
  0xd7   :  { %v125_v37 = vmax.f32 %v122_v35, 0.0 }
  0xd9   :  { %414 = vmatmul.mubr.f32.vlgmr.msra.gmra.mxu1 %v125_v37 }
 0x199   :  { %v215_v42 = vpop.f32.mrf.mxu1 }
 0x19a   :  { %v216_v43 = vadd.f32 %v335_v41, %v215_v42 }
 0x19b   :  { %v415_v44 = vpop.f32.mrf.mxu1 }
 0x19c   :  { %v219_v45 = vmax.f32 %v216_v43, 0.0 }
 0x19e   :  { %449 = vmatmul.mubr.f32.vlgmr.msra.gmra.mxu0 %v219_v45 }
 0x25e   :  { %v309_v47 = vpop.f32.mrf.mxu0 }
 0x25f   :  { %v310_v48 = vadd.f32 %v336_v46, %v309_v47 }
 0x260   :  { %v450_v49 = vpop.f32.mrf.mxu0 }
 0x261   :  { %v313_v50 = vmax.f32 %v310_v48, 0.0 }
 0x263   :  { %315 = vst.msk [vmem:[#allocation5] sm:$0xff] %vm314_vm2, %v313_v50 }
 0x264   :  { %320 = vsyncadd [#allocation4], 96  ;;  %s508_s5 = smov [#allocation5]  }
 0x265   :  { %s321_s25 = sshll.u32 %s508_s5, 4  ;;  %s322_s25 = int_to_ptr.vmem [resolvable:$true] %s321_s25 }
 0x266   :  { %s479_s4 = scalar_lea.vmem %s322_s25, 32  ;;  %s483_s26 = scalar_lea.vmem %s322_s25, 128 }
 0x267   :  { %p480_p5 = scmp.ne.s32.totalorder %s322_s25, %s479_s4  ;;  %p484_p6 = scmp.lt.s32.totalorder %s322_s25, %s322_s25 }
 0x268   :  { %p485_p7 = scmp.lt.s32.totalorder %s483_s26, %s479_s4 }
 0x26a   :  { %p486_p8 = por %p485_p7, %p484_p6 }
 0x26c   :  { %p487_p9 = pnand %p486_p8, %p480_p5 }
 0x26e   :  { %490 = shalt.err (!%p487_p9)
}
 0x26f   :  { %s509_s27 = smov 32   ;;  %s510_s6 = smov 2  }
 0x270   :  { %327 = dma.vmem_to_hbm [thread:$0]  %s322_s25, 32, %s712_s7, [#allocation4], %s509_s27, %s509_s27, %s510_s6  }
 0x271   :  { %501 = dma.done.wait [#allocation4], 128  }
 0x272   :  { %502 = vsyncadd [#allocation4], 4294967168 }
 0x273   :  { %331 = vsyncpa [#allocation3], 1 }
 0x274   :  { %332 = vsyncpa [#allocation4], 1 }

</bundles_post_ra>
